<compile_context>
chip_gen: v6e
topology: v6e:2x2x1
jax: 0.10.0
libtpu: 0.0.40
codegen_flags: <defaults>
</compile_context>

<pallas_src>
import jax
import jax.numpy as jnp
from jax.experimental import pallas as pl
from jax.experimental.pallas import tpu as pltpu

LANES = 128


def _where_kernel(x_ref, y_ref, o_ref):
    x = x_ref[...]
    y = y_ref[...]
    o_ref[...] = jnp.where(x > 0, x, y)


def _vmem_capacity_bytes():
    """Physical VMEM per TensorCore; conservative fallback if query fails."""
    try:
        return int(pltpu.get_tpu_info().vmem_capacity_bytes)
    except Exception:
        return 64 * 1024 * 1024  # assume smallest (v7x-class) if unknown


def net_where(x, y, *, tile_rows=8192):
    """Elementwise where(x > 0, x, y) via a Pallas TPU kernel.

    x, y: arrays of identical shape/dtype (any shape).
    """
    assert x.shape == y.shape and x.dtype == y.dtype
    orig_shape = x.shape
    n = x.size
    itemsize = jnp.dtype(x.dtype).itemsize
    # Sublane packing multiple: 8 for 4-byte, 16 for 2-byte, 32 for 1-byte.
    sublane = max(8, 32 // itemsize)

    xf = x.reshape(-1)
    yf = y.reshape(-1)

    # View the flat array as a lane-dense (rows, 128) slab. Only if n is not
    # already a multiple of 128 do we pad (by < 128 elements).  For the
    # module's (2,4,16,16) f32 workload n == 2048, so no pad / no copy.
    # TODO(synk): handle the sub-128 tail of very large unaligned inputs with
    # an in-kernel masked store instead of a wrapper-side pad copy.
    lane_pad = (-n) % LANES
    if lane_pad:
        xf = jnp.pad(xf, (0, lane_pad))
        yf = jnp.pad(yf, (0, lane_pad))
    rows = (n + lane_pad) // LANES
    x2 = xf.reshape(rows, LANES)
    y2 = yf.reshape(rows, LANES)

    small_vmem = _vmem_capacity_bytes() <= 64 * 1024 * 1024  # v7x-class chip

    # ---------------- single-block fast path (no grid) ----------------
    # Tiny slabs: grid/pipeline prologue-epilogue is pure overhead.  Keep the
    # threshold low enough that (a) 3 buffers stay far below every chip's
    # default scoped-VMEM limit and (b) on v7x the megacore-parallel gridded
    # path takes over early for mid-size arrays.
    fast_bytes_per_buf = (1 if small_vmem else 2) * 1024 * 1024
    if rows * LANES * itemsize <= fast_bytes_per_buf:
        out2 = pl.pallas_call(
            _where_kernel,
            out_shape=jax.ShapeDtypeStruct((rows, LANES), x.dtype),
        )(x2, y2)
        if lane_pad:
            return out2.reshape(-1)[:n].reshape(orig_shape)
        return out2.reshape(orig_shape)

    # ---------------- gridded path for large arrays ----------------
    # ~4 MiB lane-dense blocks; double-buffered footprint (3 arrays x 2 bufs
    # x block) capped at 24 MiB -> roofline-saturating on v5e/v6e/v7x while
    # leaving headroom under v7x's 64 MiB physical VMEM.
    max_block_rows = (24 * 1024 * 1024) // (6 * LANES * itemsize)
    block_rows = max(sublane, (min(tile_rows, max_block_rows) // sublane) * sublane)
    grid = pl.cdiv(rows, block_rows)  # ragged last block: masked store, no pad

    # Raise the scoped-VMEM limit only when the footprint actually needs it
    # (defaults: 16 MiB v5e / 32 MiB v6e,v7x); clamp so it is v7x-safe.
    footprint = 6 * block_rows * LANES * itemsize
    needed = footprint + 2 * 1024 * 1024
    vmem_limit = min(needed, 32 * 1024 * 1024) if needed > 14 * 1024 * 1024 else None

    # NOTE: if profiling on v7x still shows exposed input DMA at ~1 us/block,
    # bump the two input BlockSpecs to pipeline_mode=pl.Buffered(3).
    out2 = pl.pallas_call(
        _where_kernel,
        out_shape=jax.ShapeDtypeStruct((rows, LANES), x.dtype),
        grid=(grid,),
        in_specs=[
            pl.BlockSpec((block_rows, LANES), lambda i: (i, 0)),
            pl.BlockSpec((block_rows, LANES), lambda i: (i, 0)),
        ],
        out_specs=pl.BlockSpec((block_rows, LANES), lambda i: (i, 0)),
        compiler_params=pltpu.CompilerParams(
            dimension_semantics=("parallel",),
            vmem_limit_bytes=vmem_limit,
        ),
    )(x2, y2)

    if lane_pad:
        return out2.reshape(-1)[:n].reshape(orig_shape)
    return out2.reshape(orig_shape)


if __name__ == "__main__":
    key = jax.random.PRNGKey(0)
    k0, k1 = jax.random.split(key)
    # inputs[0], inputs[1]: same shape, (B, C, H, W) = (2, 4, 16, 16)
    shape = (2, 4, 16, 16)
    x = jax.random.normal(k0, shape, dtype=jnp.float32)
    y = jax.random.normal(k1, shape, dtype=jnp.float32)

    out = net_where(x, y)
    out = jax.block_until_ready(out)

    # correctness check against plain JAX reference
    ref = jnp.where(x > 0, x, y)
    assert out.shape == ref.shape and out.dtype == ref.dtype
    assert bool(jnp.all(out == ref))
    print("KERNEL_OK")
</pallas_src>

<mosaic_0001>
module attributes {stable_mosaic.version = 11 : i64} {
  func.func @_where_kernel(%arg0: memref<16x128xf32, #tpu.memory_space<vmem>>, %arg1: memref<16x128xf32, #tpu.memory_space<vmem>>, %arg2: memref<16x128xf32, #tpu.memory_space<vmem>>) attributes {dimension_semantics = [], scalar_prefetch = 0 : i64, scratch_operands = 0 : i64, tpu.core_type = #tpu.core_type<tc>} {
    %c0 = arith.constant 0 : index
    %c0_0 = arith.constant 0 : index
    %0 = vector.load %arg0[%c0, %c0_0] : memref<16x128xf32, #tpu.memory_space<vmem>>, vector<16x128xf32>
    %c0_1 = arith.constant 0 : index
    %c0_2 = arith.constant 0 : index
    %1 = vector.load %arg1[%c0_1, %c0_2] : memref<16x128xf32, #tpu.memory_space<vmem>>, vector<16x128xf32>
    %cst = arith.constant 0.000000e+00 : f32
    %2 = vector.broadcast %cst : f32 to vector<16x128xf32>
    %3 = arith.cmpf ogt, %0, %2 : vector<16x128xf32>
    %4 = arith.select %3, %0, %1 : vector<16x128xi1>, vector<16x128xf32>
    %c0_3 = arith.constant 0 : index
    %c0_4 = arith.constant 0 : index
    %5 = vector.load %arg2[%c0_3, %c0_4] : memref<16x128xf32, #tpu.memory_space<vmem>>, vector<16x128xf32>
    tpu.vector_store %arg2[%c0_3, %c0_4], %4 {strides = array<i32>} : memref<16x128xf32, #tpu.memory_space<vmem>>, vector<16x128xf32>,
    return
  }
}

</mosaic_0001>

<bundles_post_ra>
// kernel: tpu_custom_call.1
= control target key start
LH: loop header
LB: loop body
LE: loop exit
PB: predicated region body
PF: predicated region fallthrough
CT: control target
= control target key end

     0   :  { %7 = vsyncpa [#allocation3], 0  ;;  %s177_s0 = inlined_call_operand.hbm [shape: f32[16,128], index: 0, kind: input, shape index: {}]   ;;  %s178_s1 = inlined_call_operand.hbm [shape: f32[16,128], index: 1, kind: input, shape index: {}]   ;;  %s179_s2 = inlined_call_operand.hbm [shape: f32[16,128], index: 2, kind: output, shape index: {}]  }
   0x1   :  { %8 = vsyncpa [#allocation6], 0 }
   0x2   :  { %9 = vsyncpa [#allocation4], 0  ;;  %s139_s9 = smov [#allocation2]  }
   0x3   :  { %s15_s10 = sshll.u32 %s139_s9, 4  ;;  %s16_s10 = int_to_ptr.vmem [resolvable:$true] %s15_s10 }
   0x4   :  { %s81_s11 = scalar_lea.vmem %s16_s10, 256  ;;  %p86_p1 = scmp.lt.s32.totalorder %s16_s10, %s16_s10 }
   0x5   :  { %p82_p0 = scmp.ne.s32.totalorder %s16_s10, %s81_s11  ;;  %p87_p2 = scmp.lt.s32.totalorder %s81_s11, %s81_s11 }
   0x7   :  { %p88_p3 = por %p87_p2, %p86_p1 }
   0x9   :  { %p89_p4 = pnand %p88_p3, %p82_p0 }
   0xb   :  { %92 = shalt.err (!%p89_p4)
}
   0xc   :  { %s140_s12 = smov 128   ;;  %s141_s13 = smov 8  }
   0xd   :  { %21 = dma.hbm_to_vmem [thread:$0]  %s177_s0, 256, %s16_s10, [#allocation3], %s140_s12, %s140_s12, %s141_s13  }
   0xe   :  { %s142_s16 = smov [#allocation5]  }
   0xf   :  { %s27_s17 = sshll.u32 %s142_s16, 4  ;;  %s28_s17 = int_to_ptr.vmem [resolvable:$true] %s27_s17 }
  0x10   :  { %s101_s18 = scalar_lea.vmem %s28_s17, 256  ;;  %p106_p6 = scmp.lt.s32.totalorder %s28_s17, %s28_s17 }
  0x11   :  { %p102_p5 = scmp.ne.s32.totalorder %s28_s17, %s101_s18  ;;  %p107_p7 = scmp.lt.s32.totalorder %s101_s18, %s101_s18 }
  0x13   :  { %p108_p8 = por %p107_p7, %p106_p6 }
  0x15   :  { %p109_p9 = pnand %p108_p8, %p102_p5 }
  0x17   :  { %112 = shalt.err (!%p109_p9)
}
  0x18   :  { %33 = dma.hbm_to_vmem [thread:$0]  %s178_s1, 256, %s28_s17, [#allocation6], %s140_s12, %s140_s12, %s141_s13  }
  0x19   :  { %133 = dma.done.wait [#allocation3], 256  }
  0x1a   :  { %134 = vsyncadd [#allocation3], 4294967040 }
  0x1b   :  { %135 = dma.done.wait [#allocation6], 256  }
  0x1c   :  { %136 = vsyncadd [#allocation6], 4294967040  ;;  %s143_s0 = smov [#allocation7]   ;;  %v40_v0 = vld [vmem:[#allocation2] sm:$0xff]  ;;  %v42_v1 = vld [vmem:[#allocation5] sm:$0xff] }
  0x1d   :  { %s55_s21 = sshll.u32 %s143_s0, 4  ;;  %v41_v2 = vld [vmem:[#allocation2 + $0x8] sm:$0xff]  ;;  %vm44_vm0 = vcmp.gt.f32.partialorder %v40_v0, 0.0  ;;  %v43_v3 = vld [vmem:[#allocation5 + $0x8] sm:$0xff]  ;;  %s56_s21 = int_to_ptr.vmem [resolvable:$true] %s55_s21 }
  0x1e   :  { %vm45_vm1 = vcmp.gt.f32.partialorder %v41_v2, 0.0  ;;  %v46_v4 = vsel %vm44_vm0, %v40_v0, %v42_v1  ;;  %s113_s22 = scalar_lea.vmem %s56_s21, 256  ;;  %p118_p11 = scmp.lt.s32.totalorder %s56_s21, %s56_s21 }
  0x1f   :  { %v47_v5 = vsel %vm45_vm1, %v41_v2, %v43_v3  ;;  %48 = vst [vmem:[#allocation7] sm:$0xff] %v46_v4  ;;  %p114_p10 = scmp.ne.s32.totalorder %s56_s21, %s113_s22  ;;  %p119_p12 = scmp.lt.s32.totalorder %s113_s22, %s113_s22 }
  0x20   :  { %49 = vst [vmem:[#allocation7 + $0x8] sm:$0xff] %v47_v5 }
  0x21   :  { %p120_p13 = por %p119_p12, %p118_p11 }
  0x23   :  { %p121_p0 = pnand %p120_p13, %p114_p10 }
  0x25   :  { %124 = shalt.err (!%p121_p0)
}
  0x26   :  { %61 = dma.vmem_to_hbm [thread:$0]  %s56_s21, 256, %s179_s2, [#allocation4], %s140_s12, %s140_s12, %s141_s13  }
  0x27   :  { %137 = dma.done.wait [#allocation4], 256  }
  0x28   :  { %138 = vsyncadd [#allocation4], 4294967040 }
  0x29   :  { %65 = vsyncpa [#allocation3], 1 }
  0x2a   :  { %66 = vsyncpa [#allocation6], 1 }
  0x2b   :  { %67 = vsyncpa [#allocation4], 1 }

</bundles_post_ra>
